<compile_context>
chip_gen: v5e
topology: v5e:2x2
jax: 0.10.0
libtpu: 0.0.40
codegen_flags: <defaults>
</compile_context>

<pallas_src>
import functools

import jax
import jax.numpy as jnp
from jax.experimental import pallas as pl
from jax.experimental.pallas import tpu as pltpu

# PyTorch F.selu constants
_SELU_ALPHA = 1.6732632423543772
_SELU_SCALE = 1.0507009873554805

LOG_STD_MIN = -5.0
LOG_STD_MAX = 2.0

_MAX_BATCH_TILE = 2048   # ~8.6 MiB total VMEM at this tile: fits every generation
_MIN_GRID_STEPS = 2      # v7x has 2 TensorCores; keep >=2 steps on the parallel axis


def _round_up(x, m):
    return ((x + m - 1) // m) * m


def _selu(x):
    # select (not multiply), so the discarded exp() branch cannot poison results.
    return _SELU_SCALE * jnp.where(x > 0, x, _SELU_ALPHA * (jnp.exp(x) - 1.0))


def _policy_kernel(out_pad,
                   state_ref,
                   w1_ref, b1_ref,
                   w2_ref, b2_ref,
                   wh_ref, bh_ref,
                   out_ref):
    # state tile (TB, O) f32 -> bf16 for the MXU
    x = state_ref[...].astype(jnp.bfloat16)

    # linear1 + SELU   (O -> Hp)
    h = jnp.dot(x, w1_ref[...], preferred_element_type=jnp.float32) + b1_ref[...]
    h = _selu(h)

    # linear2 + SELU   (Hp -> Hp)
    h = jnp.dot(h.astype(jnp.bfloat16), w2_ref[...],
                preferred_element_type=jnp.float32) + b2_ref[...]
    h = _selu(h)

    # fused mean | log-std heads  (Hp -> 2*out_pad): one MXU pass
    heads = jnp.dot(h.astype(jnp.bfloat16), wh_ref[...],
                    preferred_element_type=jnp.float32) + bh_ref[...]

    # Two aligned, lane-dense stores (out_pad is a multiple of 128): mean half
    # untouched, only the log-std half clamped.  No iota / select epilogue.
    out_ref[:, :out_pad] = heads[:, :out_pad]
    out_ref[:, out_pad:] = jnp.clip(heads[:, out_pad:], LOG_STD_MIN, LOG_STD_MAX)


@functools.partial(jax.jit, static_argnames=("n_heads", "action_dim", "max_nheads"))
def multihead_gaussian_policy_forward(state, params, *, n_heads, action_dim,
                                      max_nheads):
    """Returns (means, log_stds), each (batch, n_heads, action_dim)."""
    w1, b1, w2, b2, wh, bh = params
    B, O = state.shape
    hidden_pad = w1.shape[1]
    out_pad2 = wh.shape[1]          # 2 * padded head width
    out_pad = out_pad2 // 2
    out_dim = action_dim * max_nheads

    # Batch tiling: sublane-aligned, capped at _MAX_BATCH_TILE, and split so the
    # "parallel" grid axis has >= _MIN_GRID_STEPS steps (v7x 2-TC sharding).
    tb = max(8, min(_MAX_BATCH_TILE, _round_up(pl.cdiv(B, _MIN_GRID_STEPS), 8)))
    b_pad = _round_up(B, tb)
    if b_pad != B:
        state = jnp.pad(state, ((0, b_pad - B), (0, 0)))

    # Advisory cost hint so XLA doesn't treat the custom call as free.
    flops = 2 * b_pad * (O * hidden_pad + hidden_pad * hidden_pad
                         + hidden_pad * out_pad2)
    transcendentals = 2 * b_pad * hidden_pad          # exp() in the two SELUs
    bytes_accessed = (b_pad * (O + out_pad2) * 4      # state in, fused slab out
                      + (w1.size + w2.size + wh.size) * 2
                      + (b1.size + b2.size + bh.size) * 4)

    const2 = lambda i: (0, 0)   # weights/biases: same block every step (VMEM-resident)

    fused = pl.pallas_call(
        functools.partial(_policy_kernel, out_pad),
        grid=(b_pad // tb,),
        in_specs=[
            pl.BlockSpec((tb, O), lambda i: (i, 0)),   # state: tiled over batch
            pl.BlockSpec(w1.shape, const2),
            pl.BlockSpec(b1.shape, const2),
            pl.BlockSpec(w2.shape, const2),
            pl.BlockSpec(b2.shape, const2),
            pl.BlockSpec(wh.shape, const2),
            pl.BlockSpec(bh.shape, const2),
        ],
        out_specs=pl.BlockSpec((tb, out_pad2), lambda i: (i, 0)),
        out_shape=jax.ShapeDtypeStruct((b_pad, out_pad2), jnp.float32),
        compiler_params=pltpu.CompilerParams(
            dimension_semantics=("parallel",),          # v7x: shard batch over 2 TCs
            vmem_limit_bytes=32 * 1024 * 1024),         # headroom for tb=2048 on v5e
        cost_estimate=pl.CostEstimate(
            flops=flops,
            transcendentals=transcendentals,
            bytes_accessed=bytes_accessed),
    )(state, w1, b1, w2, b2, wh, bh)

    if out_pad % action_dim == 0:
        # Head-padded layout: columns [out_dim, out_pad) are whole zero heads, so
        # the reshape below is a pure view — no 200-lane slice+reshape copy.
        heads_pad = out_pad // action_dim
        r = fused[:B].reshape(B, 2, heads_pad, action_dim)
        means = r[:, 0, :n_heads, :]
        log_stds = r[:, 1, :n_heads, :]
    else:
        means = fused[:B, :out_dim].reshape(B, max_nheads, action_dim)[:, :n_heads, :]
        log_stds = fused[:B, out_pad:out_pad + out_dim].reshape(
            B, max_nheads, action_dim)[:, :n_heads, :]
    return means, log_stds


def _xavier_uniform(key, fan_in, fan_out, gain=1.0):
    # Matches torch.nn.init.xavier_uniform_; stored as (in, out).
    bound = gain * jnp.sqrt(6.0 / (fan_in + fan_out))
    return jax.random.uniform(key, (fan_in, fan_out), jnp.float32,
                              minval=-bound, maxval=bound)


def _pad_to(x, shape):
    return jnp.pad(x, [(0, t - s) for s, t in zip(x.shape, shape)])


def init_params(key, observation_dim, action_dim, hidden_dim=32, max_nheads=50):
    """weights_init_: xavier_uniform(gain=1) on Linear weights, zero biases,
    then mean_linear.weight re-initialized with xavier_uniform(gain=0.001).
    Weights zero-padded (hidden -> mult of 128, head out -> mult of 128 which
    equals whole padded heads when action_dim divides it), heads fused, stored
    bf16; biases stay f32.  Padding is mathematically exact (padded lanes stay 0
    through SELU and are sliced away)."""
    out_dim = action_dim * max_nheads
    hidden_pad = _round_up(hidden_dim, 128)
    out_pad = _round_up(out_dim, 128)

    k1, k2, k3, k4 = jax.random.split(key, 4)
    w1 = _xavier_uniform(k1, observation_dim, hidden_dim, gain=1.0)
    w2 = _xavier_uniform(k2, hidden_dim, hidden_dim, gain=1.0)
    wm = _xavier_uniform(k3, hidden_dim, out_dim, gain=0.001)
    ws = _xavier_uniform(k4, hidden_dim, out_dim, gain=1.0)

    w1p = _pad_to(w1, (observation_dim, hidden_pad)).astype(jnp.bfloat16)
    w2p = _pad_to(w2, (hidden_pad, hidden_pad)).astype(jnp.bfloat16)
    wmp = _pad_to(wm, (hidden_pad, out_pad))
    wsp = _pad_to(ws, (hidden_pad, out_pad))
    wh = jnp.concatenate([wmp, wsp], axis=1).astype(jnp.bfloat16)  # (Hp, 2*out_pad)

    b1 = jnp.zeros((1, hidden_pad), jnp.float32)
    b2 = jnp.zeros((1, hidden_pad), jnp.float32)
    bh = jnp.zeros((1, 2 * out_pad), jnp.float32)
    return (w1p, b1, w2p, b2, wh, bh)


def _reference_forward(state, params, *, n_heads, action_dim, max_nheads):
    """Pure-JAX f32 reference (same bf16-stored weights, f32 math) for tolerance."""
    w1, b1, w2, b2, wh, bh = params
    out_dim = action_dim * max_nheads
    out_pad = wh.shape[1] // 2
    h = _selu(state @ w1.astype(jnp.float32) + b1)
    h = _selu(h @ w2.astype(jnp.float32) + b2)
    heads = h @ wh.astype(jnp.float32) + bh
    means = heads[:, :out_dim].reshape(-1, max_nheads, action_dim)[:, :n_heads, :]
    log_stds = heads[:, out_pad:out_pad + out_dim].reshape(
        -1, max_nheads, action_dim)[:, :n_heads, :]
    log_stds = jnp.clip(log_stds, LOG_STD_MIN, LOG_STD_MAX)
    return means, log_stds


if __name__ == "__main__":
    # Small deterministic configuration matching the module defaults:
    # num_layers=2, resnet=False, layernorm=False, fta=False, max_nheads=50.
    observation_dim = 16
    action_dim = 4
    hidden_dim = 32
    max_nheads = 50
    n_heads = 8
    batch = 2

    root = jax.random.PRNGKey(0)
    k_params, k_state = jax.random.split(root)

    params = init_params(k_params, observation_dim, action_dim,
                         hidden_dim=hidden_dim, max_nheads=max_nheads)
    state = jax.random.normal(k_state, (batch, observation_dim), jnp.float32)

    means, log_stds = multihead_gaussian_policy_forward(
        state, params, n_heads=n_heads, action_dim=action_dim,
        max_nheads=max_nheads)
    jax.block_until_ready((means, log_stds))

    assert means.shape == (batch, n_heads, action_dim)
    assert log_stds.shape == (batch, n_heads, action_dim)
    assert bool(jnp.all(jnp.isfinite(means)))
    assert bool(jnp.all(log_stds >= LOG_STD_MIN)) and bool(jnp.all(log_stds <= LOG_STD_MAX))

    # Tolerance check vs. f32 reference (in-kernel bf16 casts -> ~0.5% rel error).
    ref_means, ref_log_stds = _reference_forward(
        state, params, n_heads=n_heads, action_dim=action_dim,
        max_nheads=max_nheads)
    assert bool(jnp.allclose(means, ref_means, rtol=5e-2, atol=5e-2))
    assert bool(jnp.allclose(log_stds, ref_log_stds, rtol=5e-2, atol=5e-2))

    print("KERNEL_OK")
</pallas_src>

<mosaic_0001>
module attributes {stable_mosaic.version = 11 : i64} {
  func.func @_policy_kernel(%arg0: i32, %arg1: memref<8x16xf32, #tpu.memory_space<vmem>>, %arg2: memref<16x128xbf16, #tpu.memory_space<vmem>>, %arg3: memref<1x128xf32, #tpu.memory_space<vmem>>, %arg4: memref<128x128xbf16, #tpu.memory_space<vmem>>, %arg5: memref<1x128xf32, #tpu.memory_space<vmem>>, %arg6: memref<128x512xbf16, #tpu.memory_space<vmem>>, %arg7: memref<1x512xf32, #tpu.memory_space<vmem>>, %arg8: memref<8x512xf32, #tpu.memory_space<vmem>>) attributes {dimension_semantics = [#tpu.dimension_semantics<parallel>], iteration_bounds = array<i64: 1>, scalar_prefetch = 0 : i64, scratch_operands = 0 : i64, tpu.core_type = #tpu.core_type<tc>, window_params = [{transform_indices = @transform_0, window_bounds = array<i64: 8, 16>}, {pipeline_mode = #tpu.pipeline_mode<synchronous>, transform_indices = @transform_1, window_bounds = array<i64: 16, 128>}, {pipeline_mode = #tpu.pipeline_mode<synchronous>, transform_indices = @transform_2, window_bounds = array<i64: 1, 128>}, {pipeline_mode = #tpu.pipeline_mode<synchronous>, transform_indices = @transform_3, window_bounds = array<i64: 128, 128>}, {pipeline_mode = #tpu.pipeline_mode<synchronous>, transform_indices = @transform_4, window_bounds = array<i64: 1, 128>}, {pipeline_mode = #tpu.pipeline_mode<synchronous>, transform_indices = @transform_5, window_bounds = array<i64: 128, 512>}, {pipeline_mode = #tpu.pipeline_mode<synchronous>, transform_indices = @transform_6, window_bounds = array<i64: 1, 512>}, {transform_indices = @transform_7, window_bounds = array<i64: 8, 512>}]} {
    %c0 = arith.constant 0 : index
    %c0_0 = arith.constant 0 : index
    %0 = vector.load %arg1[%c0, %c0_0] : memref<8x16xf32, #tpu.memory_space<vmem>>, vector<8x16xf32>
    %1 = arith.truncf %0 : vector<8x16xf32> to vector<8x16xbf16>
    %c0_1 = arith.constant 0 : index
    %c0_2 = arith.constant 0 : index
    %2 = vector.load %arg2[%c0_1, %c0_2] : memref<16x128xbf16, #tpu.memory_space<vmem>>, vector<16x128xbf16>
    %cst = arith.constant dense<0.000000e+00> : vector<8x128xf32>
    %3 = tpu.matmul %1, %2, %cst {dimension_numbers = #tpu.dot_dimension_numbers<[1], [0], [0], [1], [0, 0, 1, 1], [], []>} : vector<8x16xbf16>, vector<16x128xbf16>, vector<8x128xf32> -> vector<8x128xf32>
    %c0_3 = arith.constant 0 : index
    %c0_4 = arith.constant 0 : index
    %4 = vector.load %arg3[%c0_3, %c0_4] : memref<1x128xf32, #tpu.memory_space<vmem>>, vector<1x128xf32>
    %5 = vector.broadcast %4 : vector<1x128xf32> to vector<8x128xf32>
    %6 = arith.addf %3, %5 : vector<8x128xf32>
    %cst_5 = arith.constant 0.000000e+00 : f32
    %7 = vector.broadcast %cst_5 : f32 to vector<8x128xf32>
    %8 = arith.cmpf ogt, %6, %7 : vector<8x128xf32>
    %9 = math.exp %6 : vector<8x128xf32>
    %cst_6 = arith.constant 1.000000e+00 : f32
    %10 = vector.broadcast %cst_6 : f32 to vector<8x128xf32>
    %11 = arith.subf %9, %10 : vector<8x128xf32>
    %cst_7 = arith.constant 1.67326319 : f32
    %12 = vector.broadcast %cst_7 : f32 to vector<8x128xf32>
    %13 = arith.mulf %12, %11 : vector<8x128xf32>
    %14 = arith.select %8, %6, %13 : vector<8x128xi1>, vector<8x128xf32>
    %cst_8 = arith.constant 1.05070102 : f32
    %15 = vector.broadcast %cst_8 : f32 to vector<8x128xf32>
    %16 = arith.mulf %15, %14 : vector<8x128xf32>
    %17 = arith.truncf %16 : vector<8x128xf32> to vector<8x128xbf16>
    %c0_9 = arith.constant 0 : index
    %c0_10 = arith.constant 0 : index
    %18 = vector.load %arg4[%c0_9, %c0_10] : memref<128x128xbf16, #tpu.memory_space<vmem>>, vector<128x128xbf16>
    %cst_11 = arith.constant dense<0.000000e+00> : vector<8x128xf32>
    %19 = tpu.matmul %17, %18, %cst_11 {dimension_numbers = #tpu.dot_dimension_numbers<[1], [0], [0], [1], [0, 0, 1, 1], [], []>} : vector<8x128xbf16>, vector<128x128xbf16>, vector<8x128xf32> -> vector<8x128xf32>
    %c0_12 = arith.constant 0 : index
    %c0_13 = arith.constant 0 : index
    %20 = vector.load %arg5[%c0_12, %c0_13] : memref<1x128xf32, #tpu.memory_space<vmem>>, vector<1x128xf32>
    %21 = vector.broadcast %20 : vector<1x128xf32> to vector<8x128xf32>
    %22 = arith.addf %19, %21 : vector<8x128xf32>
    %cst_14 = arith.constant 0.000000e+00 : f32
    %23 = vector.broadcast %cst_14 : f32 to vector<8x128xf32>
    %24 = arith.cmpf ogt, %22, %23 : vector<8x128xf32>
    %25 = math.exp %22 : vector<8x128xf32>
    %cst_15 = arith.constant 1.000000e+00 : f32
    %26 = vector.broadcast %cst_15 : f32 to vector<8x128xf32>
    %27 = arith.subf %25, %26 : vector<8x128xf32>
    %cst_16 = arith.constant 1.67326319 : f32
    %28 = vector.broadcast %cst_16 : f32 to vector<8x128xf32>
    %29 = arith.mulf %28, %27 : vector<8x128xf32>
    %30 = arith.select %24, %22, %29 : vector<8x128xi1>, vector<8x128xf32>
    %cst_17 = arith.constant 1.05070102 : f32
    %31 = vector.broadcast %cst_17 : f32 to vector<8x128xf32>
    %32 = arith.mulf %31, %30 : vector<8x128xf32>
    %33 = arith.truncf %32 : vector<8x128xf32> to vector<8x128xbf16>
    %c0_18 = arith.constant 0 : index
    %c0_19 = arith.constant 0 : index
    %34 = vector.load %arg6[%c0_18, %c0_19] : memref<128x512xbf16, #tpu.memory_space<vmem>>, vector<128x512xbf16>
    %cst_20 = arith.constant dense<0.000000e+00> : vector<8x512xf32>
    %35 = tpu.matmul %33, %34, %cst_20 {dimension_numbers = #tpu.dot_dimension_numbers<[1], [0], [0], [1], [0, 0, 1, 1], [], []>} : vector<8x128xbf16>, vector<128x512xbf16>, vector<8x512xf32> -> vector<8x512xf32>
    %c0_21 = arith.constant 0 : index
    %c0_22 = arith.constant 0 : index
    %36 = vector.load %arg7[%c0_21, %c0_22] : memref<1x512xf32, #tpu.memory_space<vmem>>, vector<1x512xf32>
    %37 = vector.broadcast %36 : vector<1x512xf32> to vector<8x512xf32>
    %38 = arith.addf %35, %37 : vector<8x512xf32>
    %39 = vector.extract_strided_slice %38 {offsets = [0, 0], sizes = [8, 256], strides = [1, 1]} : vector<8x512xf32> to vector<8x256xf32>
    %c0_23 = arith.constant 0 : index
    %c0_24 = arith.constant 0 : index
    %40 = vector.load %arg8[%c0_23, %c0_24] : memref<8x512xf32, #tpu.memory_space<vmem>>, vector<8x256xf32>
    tpu.vector_store %arg8[%c0_23, %c0_24], %39 {strides = array<i32>} : memref<8x512xf32, #tpu.memory_space<vmem>>, vector<8x256xf32>,
    %41 = vector.extract_strided_slice %38 {offsets = [0, 256], sizes = [8, 256], strides = [1, 1]} : vector<8x512xf32> to vector<8x256xf32>
    %cst_25 = arith.constant -5.000000e+00 : f32
    %cst_26 = arith.constant 2.000000e+00 : f32
    %42 = vector.broadcast %cst_25 : f32 to vector<8x256xf32>
    %43 = arith.maximumf %42, %41 : vector<8x256xf32>
    %44 = vector.broadcast %cst_26 : f32 to vector<8x256xf32>
    %45 = arith.minimumf %44, %43 : vector<8x256xf32>
    %c0_27 = arith.constant 0 : index
    %c256 = arith.constant 256 : index
    %46 = vector.load %arg8[%c0_27, %c256] : memref<8x512xf32, #tpu.memory_space<vmem>>, vector<8x256xf32>
    tpu.vector_store %arg8[%c0_27, %c256], %45 {strides = array<i32>} : memref<8x512xf32, #tpu.memory_space<vmem>>, vector<8x256xf32>,
    return
  }
  func.func @transform_0(%arg0: i32) -> (i32, i32) {
    %c0_i32 = arith.constant 0 : i32
    %c0_i32_0 = arith.constant 0 : i32
    return %arg0, %c0_i32 : i32, i32
  }
  func.func @transform_1(%arg0: i32) -> (i32, i32) {
    %c0_i32 = arith.constant 0 : i32
    %c0_i32_0 = arith.constant 0 : i32
    %c0_i32_1 = arith.constant 0 : i32
    return %c0_i32, %c0_i32_0 : i32, i32
  }
  func.func @transform_2(%arg0: i32) -> (i32, i32) {
    %c0_i32 = arith.constant 0 : i32
    %c0_i32_0 = arith.constant 0 : i32
    %c0_i32_1 = arith.constant 0 : i32
    return %c0_i32, %c0_i32_0 : i32, i32
  }
  func.func @transform_3(%arg0: i32) -> (i32, i32) {
    %c0_i32 = arith.constant 0 : i32
    %c0_i32_0 = arith.constant 0 : i32
    %c0_i32_1 = arith.constant 0 : i32
    return %c0_i32, %c0_i32_0 : i32, i32
  }
  func.func @transform_4(%arg0: i32) -> (i32, i32) {
    %c0_i32 = arith.constant 0 : i32
    %c0_i32_0 = arith.constant 0 : i32
    %c0_i32_1 = arith.constant 0 : i32
    return %c0_i32, %c0_i32_0 : i32, i32
  }
  func.func @transform_5(%arg0: i32) -> (i32, i32) {
    %c0_i32 = arith.constant 0 : i32
    %c0_i32_0 = arith.constant 0 : i32
    %c0_i32_1 = arith.constant 0 : i32
    return %c0_i32, %c0_i32_0 : i32, i32
  }
  func.func @transform_6(%arg0: i32) -> (i32, i32) {
    %c0_i32 = arith.constant 0 : i32
    %c0_i32_0 = arith.constant 0 : i32
    %c0_i32_1 = arith.constant 0 : i32
    return %c0_i32, %c0_i32_0 : i32, i32
  }
  func.func @transform_7(%arg0: i32) -> (i32, i32) {
    %c0_i32 = arith.constant 0 : i32
    %c0_i32_0 = arith.constant 0 : i32
    return %arg0, %c0_i32 : i32, i32
  }
}

</mosaic_0001>

<bundles_post_ra>
// kernel: multihead_gaussian_policy_forward.1
= control target key start
LH: loop header
LB: loop body
LE: loop exit
PB: predicated region body
PF: predicated region fallthrough
CT: control target
= control target key end

     0   :  { %12 = vsyncpa [#allocation3], 0  ;;  %s845_s0 = inlined_call_operand.vmem [shape: f32[8,16], index: 0, kind: input, shape index: {}]   ;;  %s846_s1 = inlined_call_operand.vmem [shape: bf16[16,128], index: 1, kind: input, shape index: {}]   ;;  %s847_s2 = inlined_call_operand.hbm [shape: f32[1,128], index: 2, kind: input, shape index: {}]   ;;  %s848_s3 = inlined_call_operand.hbm [shape: bf16[128,128], index: 3, kind: input, shape index: {}]   ;;  %s849_s4 = inlined_call_operand.vmem [shape: f32[1,128], index: 4, kind: input, shape index: {}]   ;;  %s850_s5 = inlined_call_operand.hbm [shape: bf16[128,512], index: 5, kind: input, shape index: {}]   ;;  %s851_s6 = inlined_call_operand.vmem [shape: f32[1,512], index: 6, kind: input, shape index: {}]   ;;  %s852_s7 = inlined_call_operand.vmem [shape: f32[8,512], index: 7, kind: output, shape index: {}]  }
   0x1   :  { %13 = vsyncpa [#allocation5], 0  ;;  %s33_s26 = sshll.u32 %s848_s3, 4  ;;  %s765_s27 = smov [#allocation4]   ;;  %s34_s26 = int_to_ptr.hbm [resolvable:$true] %s33_s26 }
   0x2   :  { %s35_s28 = sshll.u32 %s765_s27, 4  ;;  %s23_s8 = sshll.u32 %s847_s2, 4  ;;  %s36_s28 = int_to_ptr.vmem [resolvable:$true] %s35_s28  ;;  %s24_s8 = int_to_ptr.hbm [resolvable:$true] %s23_s8 }
   0x3   :  { %s766_s9 = smov 64   ;;  %s767_s10 = smov 4  }
   0x4   :  { %41 = dma.hbm_to_vmem [thread:$0]  %s34_s26, 1024, %s36_s28, [#allocation5], %s766_s9, %s766_s9, %s767_s10  }
   0x5   :  { %s768_s11 = smov [#allocation2]   ;;  %s48_s15 = sshll.u32 %s850_s5, 4  ;;  %s49_s15 = int_to_ptr.hbm [resolvable:$true] %s48_s15 }
   0x6   :  { %s25_s12 = sshll.u32 %s768_s11, 4  ;;  %s769_s3 = smov [#allocation6]   ;;  %s26_s12 = int_to_ptr.vmem [resolvable:$true] %s25_s12 }
   0x7   :  { %28 = dma.hbm_to_vmem [thread:$0]  %s24_s8, 16, %s26_s12, [#allocation3]  }
   0x8   :  { %s50_s16 = sshll.u32 %s769_s3, 4  ;;  %s770_s17 = smov 256   ;;  %s51_s16 = int_to_ptr.vmem [resolvable:$true] %s50_s16 }
   0x9   :  { %s771_s18 = smov 16  }
   0xa   :  { %56 = dma.hbm_to_vmem [thread:$0]  %s49_s15, 4096, %s51_s16, [#allocation5], %s770_s17, %s770_s17, %s771_s18  }
   0xb   :  { %761 = dma.done.wait [#allocation3], 16  }
   0xc   :  { %762 = vsyncadd [#allocation3], 4294967280 }
   0xd   :  { %763 = dma.done.wait [#allocation5], 5120  }
   0xe   :  { %764 = vsyncadd [#allocation5], 4294962176  ;;  %v635_v0 = vld [vmem:[%s846_s1] sm:$0xff]  ;;  %vm86_vm0 = vcmask 130048   ;;  %v642_v4 = vld [vmem:[#allocation4 + $0x30] sm:$0xff] }
   0xf   :  { %v72_v1 = vld [vmem:[%s845_s0] sm:$0xff]  ;;  %97 = vmatpush.bf16.msra.mxu0 %v635_v0  ;;  %v641_v5 = vld [vmem:[#allocation4 + $0x28] sm:$0xff]  ;;  %v638_v8 = vld [vmem:[#allocation4 + $0x10] sm:$0xff] }
  0x10   :  { %v643_v2 = vld [vmem:[#allocation4 + $0x38] sm:$0xff]  ;;  %v73_v3 = vpack.c.bf16 %v72_v1, %v72_v1  ;;  %v640_v6 = vld [vmem:[#allocation4 + $0x20] sm:$0xff]  ;;  %v637_v9 = vld [vmem:[#allocation4 + $0x8] sm:$0xff] }
  0x11   :  { %179 = vmatpush.bf16.msra.mxu1 %v643_v2  ;;  %v639_v7 = vld [vmem:[#allocation4 + $0x18] sm:$0xff]  ;;  %v636_v10 = vld [vmem:[#allocation4] sm:$0xff]  ;;  %v674_v12 = vld [vmem:[#allocation6 + $0xec] sm:$0xf0] }
  0x12   :  { %472 = vmatmul.msk.bf16.vlgmr.msra.gmra.mxu0 %vm86_vm0, %v73_v3  ;;  %v621_v11 = vld [vmem:[#allocation6 + $0xe0] sm:$0xf]  ;;  %v672_v13 = vld [vmem:[#allocation6 + $0xe4] sm:$0xf]  ;;  %v623_v15 = vld [vmem:[#allocation6 + $0xf0] sm:$0xf0] }
  0x13   :  { %v622_v14 = vor.u32 %v674_v12, %v621_v11  ;;  %v629_v16 = vld [vmem:[#allocation6 + $0xe8] sm:$0xf]  ;;  %v675_v17 = vld [vmem:[#allocation6 + $0xf4] sm:$0xf0]  ;;  %v626_v18 = vor.u32 %v672_v13, %v623_v15  ;;  %v673_v20 = vld [vmem:[#allocation6 + $0xec] sm:$0xf] }
  0x14   :  { %v630_v19 = vor.u32 %v675_v17, %v629_v16  ;;  %v631_v21 = vld [vmem:[#allocation6 + $0xf8] sm:$0xf0]  ;;  %v605_v22 = vld [vmem:[#allocation6 + $0xc0] sm:$0xf]  ;;  %v670_v24 = vld [vmem:[#allocation6 + $0xcc] sm:$0xf0] }
  0x15   :  { %180 = vmatpush.bf16.msra.mxu1 %v642_v4  ;;  %402 = vmatpush.bf16.msra.mxu2 %v622_v14  ;;  %v634_v23 = vor.u32 %v673_v20, %v631_v21  ;;  %v668_v25 = vld [vmem:[#allocation6 + $0xc4] sm:$0xf]  ;;  %v607_v26 = vld [vmem:[#allocation6 + $0xd0] sm:$0xf0]  ;;  %v606_v27 = vor.u32 %v670_v24, %v605_v22  ;;  %v613_v29 = vld [vmem:[#allocation6 + $0xc8] sm:$0xf] }
  0x16   :  { %415 = vmatpush.bf16.msra.mxu3 %v626_v18  ;;  %428 = vmatpush.bf16.msrb.mxu0 %v630_v19  ;;  %v610_v28 = vor.u32 %v668_v25, %v607_v26  ;;  %v671_v30 = vld [vmem:[#allocation6 + $0xd4] sm:$0xf0]  ;;  %v669_v31 = vld [vmem:[#allocation6 + $0xcc] sm:$0xf]  ;;  %v615_v33 = vld [vmem:[#allocation6 + $0xd8] sm:$0xf0] }
  0x17   :  { %v614_v32 = vor.u32 %v671_v30, %v613_v29  ;;  %v589_v34 = vld [vmem:[#allocation6 + $0xa0] sm:$0xf]  ;;  %v666_v35 = vld [vmem:[#allocation6 + $0xac] sm:$0xf0]  ;;  %v618_v36 = vor.u32 %v669_v31, %v615_v33  ;;  %v664_v37 = vld [vmem:[#allocation6 + $0xa4] sm:$0xf] }
  0x18   :  { %v591_v38 = vld [vmem:[#allocation6 + $0xb0] sm:$0xf0]  ;;  %v597_v39 = vld [vmem:[#allocation6 + $0xa8] sm:$0xf]  ;;  %v590_v40 = vor.u32 %v666_v35, %v589_v34  ;;  %v667_v41 = vld [vmem:[#allocation6 + $0xb4] sm:$0xf0] }
  0x19   :  { %181 = vmatpush.bf16.msra.mxu1 %v641_v5  ;;  %403 = vmatpush.bf16.msra.mxu2 %v606_v27  ;;  %v665_v42 = vld [vmem:[#allocation6 + $0xac] sm:$0xf]  ;;  %v599_v43 = vld [vmem:[#allocation6 + $0xb8] sm:$0xf0]  ;;  %v594_v45 = vor.u32 %v664_v37, %v591_v38  ;;  %v598_v46 = vor.u32 %v667_v41, %v597_v39  ;;  %v573_v58 = vld [vmem:[#allocation6 + $0x80] sm:$0xf] }
  0x1a   :  { %v683_v44 = vld [vmem:[#allocation2] ss:$0 sm:$0xff]  ;;  %416 = vmatpush.bf16.msra.mxu3 %v610_v28  ;;  %429 = vmatpush.bf16.msrb.mxu0 %v614_v32  ;;  %v602_v47 = vor.u32 %v665_v42, %v599_v43  ;;  %v662_v59 = vld [vmem:[#allocation6 + $0x8c] sm:$0xf0]  ;;  %v660_v60 = vld [vmem:[#allocation6 + $0x84] sm:$0xf] }
  0x1b   :  { %v574_v61 = vor.u32 %v662_v59, %v573_v58  ;;  %v575_v62 = vld [vmem:[#allocation6 + $0x90] sm:$0xf0]  ;;  %v581_v63 = vld [vmem:[#allocation6 + $0x88] sm:$0xf]  ;;  %v663_v0 = vld [vmem:[#allocation6 + $0x94] sm:$0xf0] }
  0x1c   :  { %v578_v1 = vor.u32 %v660_v60, %v575_v62  ;;  %v582_v2 = vor.u32 %v663_v0, %v581_v63  ;;  %v661_v3 = vld [vmem:[#allocation6 + $0x8c] sm:$0xf]  ;;  %v583_v4 = vld [vmem:[#allocation6 + $0x98] sm:$0xf0]  ;;  %v565_v11 = vld [vmem:[#allocation6 + $0x68] sm:$0xf] }
  0x1d   :  { %182 = vmatpush.bf16.msra.mxu1 %v640_v6  ;;  %404 = vmatpush.bf16.msra.mxu2 %v590_v40  ;;  %v586_v5 = vor.u32 %v661_v3, %v583_v4  ;;  %v557_v6 = vld [vmem:[#allocation6 + $0x60] sm:$0xf]  ;;  %v659_v12 = vld [vmem:[#allocation6 + $0x74] sm:$0xf0]  ;;  %v657_v15 = vld [vmem:[#allocation6 + $0x6c] sm:$0xf] }
  0x1e   :  { %417 = vmatpush.bf16.msra.mxu3 %v594_v45  ;;  %430 = vmatpush.bf16.msrb.mxu0 %v598_v46  ;;  %v566_v14 = vor.u32 %v659_v12, %v565_v11  ;;  %v567_v16 = vld [vmem:[#allocation6 + $0x78] sm:$0xf0]  ;;  %v541_v18 = vld [vmem:[#allocation6 + $0x40] sm:$0xf]  ;;  %v654_v19 = vld [vmem:[#allocation6 + $0x4c] sm:$0xf0] }
  0x1f   :  { %v570_v17 = vor.u32 %v657_v15, %v567_v16  ;;  %v652_v20 = vld [vmem:[#allocation6 + $0x44] sm:$0xf]  ;;  %v542_v21 = vor.u32 %v654_v19, %v541_v18  ;;  %v543_v22 = vld [vmem:[#allocation6 + $0x50] sm:$0xf0]  ;;  %v655_v24 = vld [vmem:[#allocation6 + $0x54] sm:$0xf0] }
  0x20   :  { %v546_v25 = vor.u32 %v652_v20, %v543_v22  ;;  %v653_v27 = vld [vmem:[#allocation6 + $0x4c] sm:$0xf]  ;;  %v551_v28 = vld [vmem:[#allocation6 + $0x58] sm:$0xf0]  ;;  %v525_v30 = vld [vmem:[#allocation6 + $0x20] sm:$0xf] }
  0x21   :  { %183 = vmatpush.bf16.msra.mxu1 %v639_v7  ;;  %405 = vmatpush.bf16.msra.mxu2 %v574_v61  ;;  %v658_v7 = vld [vmem:[#allocation6 + $0x6c] sm:$0xf0]  ;;  %v554_v29 = vor.u32 %v653_v27, %v551_v28  ;;  %v648_v32 = vld [vmem:[#allocation6 + $0x24] sm:$0xf]  ;;  %v527_v34 = vld [vmem:[#allocation6 + $0x30] sm:$0xf0] }
  0x22   :  { %418 = vmatpush.bf16.msra.mxu3 %v578_v1  ;;  %431 = vmatpush.bf16.msrb.mxu0 %v582_v2  ;;  %v650_v31 = vld [vmem:[#allocation6 + $0x2c] sm:$0xf0]  ;;  %v533_v35 = vld [vmem:[#allocation6 + $0x28] sm:$0xf]  ;;  %v530_v37 = vor.u32 %v648_v32, %v527_v34  ;;  %v649_v39 = vld [vmem:[#allocation6 + $0x2c] sm:$0xf] }
  0x23   :  { %v526_v33 = vor.u32 %v650_v31, %v525_v30  ;;  %v535_v40 = vld [vmem:[#allocation6 + $0x38] sm:$0xf0]  ;;  %v509_v42 = vld [vmem:[#allocation6] sm:$0xf]  ;;  %v646_v43 = vld [vmem:[#allocation6 + $0xc] sm:$0xf0] }
  0x24   :  { %v538_v41 = vor.u32 %v649_v39, %v535_v40  ;;  %v510_v45 = vor.u32 %v646_v43, %v509_v42  ;;  %v511_v46 = vld [vmem:[#allocation6 + $0x10] sm:$0xf0]  ;;  %v232_v1 = vld [vmem:[%s851_s6] sm:$0xf] }
  0x25   :  { %184 = vmatpush.bf16.msra.mxu1 %v638_v8  ;;  %v656_v8 = vld [vmem:[#allocation6 + $0x64] sm:$0xf]  ;;  %v236_v2 = vperm.slane %v232_v1, 2  ;;  %v237_v3 = vperm.slane %v232_v1, 3 }
  0x26   :  { %432 = vmatpush.bf16.msrb.mxu0 %v566_v14 }
  0x29   :  { %185 = vmatpush.bf16.msra.mxu1 %v637_v9  ;;  %v558_v9 = vor.u32 %v658_v7, %v557_v6 }
  0x2b   :  { %406 = vmatpush.bf16.msra.mxu2 %v558_v9  ;;  %v235_v9 = vperm.slane %v232_v1, 1 }
  0x2d   :  { %186 = vmatpush.bf16.msra.mxu1 %v636_v10  ;;  %v559_v10 = vld [vmem:[#allocation6 + $0x70] sm:$0xf0] }
  0x2e   :  { %v562_v13 = vor.u32 %v656_v8, %v559_v10  ;;  %v234_v8 = vperm.slane %v232_v1, 0 }
  0x2f   :  { %407 = vmatpush.bf16.msra.mxu2 %v542_v21 }
  0x30   :  { %419 = vmatpush.bf16.msra.mxu3 %v562_v13 }
  0x31   :  { %441 = vmatpush.bf16.msrb.mxu1 %v634_v23  ;;  %v549_v23 = vld [vmem:[#allocation6 + $0x48] sm:$0xf] }
  0x32   :  { %v550_v26 = vor.u32 %v655_v24, %v549_v23 }
  0x33   :  { %408 = vmatpush.bf16.msra.mxu2 %v526_v33 }
  0x34   :  { %420 = vmatpush.bf16.msra.mxu3 %v546_v25  ;;  %433 = vmatpush.bf16.msrb.mxu0 %v550_v26 }
  0x35   :  { %442 = vmatpush.bf16.msrb.mxu1 %v618_v36  ;;  %v651_v36 = vld [vmem:[#allocation6 + $0x34] sm:$0xf0] }
  0x36   :  { %v534_v38 = vor.u32 %v651_v36, %v533_v35 }
  0x37   :  { %409 = vmatpush.bf16.msra.mxu2 %v510_v45 }
  0x38   :  { %421 = vmatpush.bf16.msra.mxu3 %v530_v37  ;;  %434 = vmatpush.bf16.msrb.mxu0 %v534_v38 }
  0x39   :  { %443 = vmatpush.bf16.msrb.mxu1 %v602_v47  ;;  %v517_v47 = vld [vmem:[#allocation6 + $0x8] sm:$0xf] }
  0x3d   :  { %444 = vmatpush.bf16.msrb.mxu1 %v586_v5 }
  0x41   :  { %445 = vmatpush.bf16.msrb.mxu1 %v570_v17 }
  0x45   :  { %446 = vmatpush.bf16.msrb.mxu1 %v554_v29 }
  0x49   :  { %447 = vmatpush.bf16.msrb.mxu1 %v538_v41 }
  0x8f   :  { %v99_v48 = vpop.f32.mrf.mxu0 }
  0x90   :  { %v100_v49 = vadd.f32 %v683_v44, %v99_v48  ;;  %v644_v44 = vld [vmem:[#allocation6 + $0x4] sm:$0xf]  ;;  %v647_v48 = vld [vmem:[#allocation6 + $0x14] sm:$0xf0] }
  0x92   :  { %v104_v50 = vmul.f32 1.442695, %v100_v49  ;;  %vm103_vm1 = vcmp.gt.f32.partialorder %v100_v49, 0.0 }
  0x94   :  { %685 = vpow2.f32 %v104_v50  ;;  %v518_v50 = vor.u32 %v647_v48, %v517_v47 }
  0x96   :  { %435 = vmatpush.bf16.msrb.mxu0 %v518_v50 }
  0x97   :  { %v101_v51 = vpop.f32.mrf.mxu0 }
  0x98   :  { %v645_v51 = vld [vmem:[#allocation6 + $0xc] sm:$0xf] }
  0x9a   :  { %v686_v52 = vpop.eup %685 }
  0x9b   :  { %v473_v53 = vadd.f32 -1.0, %v686_v52  ;;  %v519_v52 = vld [vmem:[#allocation6 + $0x18] sm:$0xf0] }
  0x9d   :  { %v107_v54 = vmul.f32 1.6732632, %v473_v53  ;;  %v522_v53 = vor.u32 %v645_v51, %v519_v52 }
  0x9f   :  { %v108_v55 = vsel %vm103_vm1, %v100_v49, %v107_v54  ;;  %v514_v49 = vor.u32 %v644_v44, %v511_v46  ;;  %448 = vmatpush.bf16.msrb.mxu1 %v522_v53  ;;  %v684_v54 = vld [vmem:[%s849_s4] ss:$0 sm:$0xff] }
  0xa0   :  { %v109_v56 = vmul.f32 1.050701, %v108_v55 }
  0xa1   :  { %422 = vmatpush.bf16.msra.mxu3 %v514_v49 }
  0xa2   :  { %v110_v57 = vpack.c.bf16 %v109_v56, %v109_v56 }
  0xa4   :  { %187 = vmatmul.bf16.vlgmr.msra.gmra.mxu1 %v110_v57 }
 0x121   :  { %v188_v55 = vpop.f32.mrf.mxu1 }
 0x122   :  { %v189_v56 = vadd.f32 %v684_v54, %v188_v55 }
 0x124   :  { %v193_v57 = vmul.f32 1.442695, %v189_v56  ;;  %vm192_vm2 = vcmp.gt.f32.partialorder %v189_v56, 0.0 }
 0x126   :  { %687 = vpow2.f32 %v193_v57 }
 0x129   :  { %v190_v58 = vpop.f32.mrf.mxu1 }
 0x12c   :  { %v688_v59 = vpop.eup %687 }
 0x12d   :  { %v506_v60 = vadd.f32 -1.0, %v688_v59 }
 0x12f   :  { %v196_v61 = vmul.f32 1.6732632, %v506_v60 }
 0x131   :  { %v197_v62 = vsel %vm192_vm2, %v189_v56, %v196_v61 }
 0x132   :  { %v198_v63 = vmul.f32 1.050701, %v197_v62 }
 0x134   :  { %v199_v0 = vpack.c.bf16 %v198_v63, %v198_v63 }
 0x136   :  { %410 = vmatmul.bf16.vlgmr.msra.gmra.mxu2 %v199_v0  ;;  %423 = vmatmul.bf16.vlgmr.msra.gmra.mxu3 %v199_v0 }
 0x137   :  { %436 = vmatmul.bf16.vlgmr.msrb.gmra.mxu0 %v199_v0  ;;  %449 = vmatmul.bf16.vlgmr.msrb.gmra.mxu1 %v199_v0 }
 0x1b4   :  { %v437_v4 = vpop.f32.mrf.mxu0  ;;  %v450_v5 = vpop.f32.mrf.mxu1 }
 0x1b5   :  { %v438_v6 = vadd.f32 %v437_v4, %v236_v2  ;;  %v451_v7 = vadd.f32 %v450_v5, %v237_v3 }
 0x1b7   :  { %v456_v10 = vmax.f32 %v438_v6, -5.0  ;;  %v457_v11 = vmax.f32 %v451_v7, -5.0 }
 0x1b9   :  { %v458_v12 = vmin.f32 %v456_v10, 2.0  ;;  %v459_v13 = vmin.f32 %v457_v11, 2.0  ;;  %v411_v14 = vpop.f32.mrf.mxu2  ;;  %v424_v15 = vpop.f32.mrf.mxu3 }
 0x1ba   :  { %v412_v16 = vadd.f32 %v411_v14, %v234_v8  ;;  %v425_v17 = vadd.f32 %v424_v15, %v235_v9 }
 0x1bb   :  { %460 = vst [vmem:[%s852_s7 + $0x10] sm:$0xff] %v458_v12 }
 0x1bc   :  { %461 = vst [vmem:[%s852_s7 + $0x18] sm:$0xff] %v459_v13  ;;  %v439_v18 = vpop.f32.mrf.mxu0  ;;  %v452_v19 = vpop.f32.mrf.mxu1 }
 0x1bd   :  { %454 = vst [vmem:[%s852_s7] sm:$0xff] %v412_v16 }
 0x1be   :  { %455 = vst [vmem:[%s852_s7 + $0x8] sm:$0xff] %v425_v17 }
 0x1c1   :  { %v413_v20 = vpop.f32.mrf.mxu2  ;;  %v426_v21 = vpop.f32.mrf.mxu3 }
 0x1c2   :  { %466 = vsyncpa [#allocation3], 1 }
 0x1c3   :  { %467 = vsyncpa [#allocation5], 1 }

</bundles_post_ra>
